<compile_context>
chip_gen: v7x
topology: tpu7x:2x2x1
jax: 0.10.0
libtpu: 0.0.40
codegen_flags: <defaults>
</compile_context>

<pallas_src>
import functools

import jax
import jax.numpy as jnp
from jax.experimental import pallas as pl
from jax.experimental.pallas import tpu as pltpu


def _round_up(n, m):
    return ((n + m - 1) // m) * m


def _vmem_capacity_bytes():
    try:
        return int(pltpu.get_tpu_info().vmem_capacity_bytes)
    except Exception:
        return 64 << 20  # conservative fallback (valid on every generation)


def policy_laplace_kernel(x_ref, w_ref, b_ref, out_ref, *, a_dim):
    # Cast activations to the weight dtype (bf16 path: cheap VPU cast, native
    # MXU rate); accumulate in f32 on the MXU.
    x = x_ref[...].astype(w_ref.dtype)
    z = jnp.dot(x, w_ref[...], preferred_element_type=jnp.float32)
    z = z + b_ref[...]  # bias add in f32
    # Lanes [0:a_dim] -> loc, [a_dim:2*a_dim] -> scale = exp(log_scale).
    # Remaining lanes are 128-alignment padding (value irrelevant; wrapper
    # slices them off). Whole-block exp runs on the EUP (its own bundle slot).
    lane = jax.lax.broadcasted_iota(jnp.int32, z.shape, 1)
    is_scale = jnp.logical_and(lane >= a_dim, lane < 2 * a_dim)
    out_ref[...] = jnp.where(is_scale, jnp.exp(z), z).astype(out_ref.dtype)


def prepare_policy_laplace_params(w_loc, b_loc, w_scale, b_scale,
                                  compute_dtype=jnp.float32):
    """One-time parameter prep (call at init, NOT per forward).

    Transposes the PyTorch-layout (a_dim, s_dim) weights and packs BOTH heads
    into a single lane block of width round_up(2*a_dim, 128):
        cols [0:a_dim]        -> loc head
        cols [a_dim:2*a_dim]  -> log_scale head
    Bias stays f32 so the post-accumulation add (and exp) keep full precision
    even when compute_dtype=jnp.bfloat16.
    """
    a_dim, s_dim = w_loc.shape
    width = _round_up(2 * a_dim, 128)
    w_fused = jnp.zeros((s_dim, width), compute_dtype)
    w_fused = w_fused.at[:, :a_dim].set(w_loc.T.astype(compute_dtype))
    w_fused = w_fused.at[:, a_dim:2 * a_dim].set(w_scale.T.astype(compute_dtype))
    b_fused = jnp.zeros((1, width), jnp.float32)
    b_fused = b_fused.at[:, :a_dim].set(b_loc.astype(jnp.float32))
    b_fused = b_fused.at[:, a_dim:2 * a_dim].set(b_scale.astype(jnp.float32))
    return w_fused, b_fused


@functools.partial(jax.jit, static_argnames=("a_dim", "tb"))
def policy_laplace_forward(x, w_fused, b_fused, *, a_dim, tb=1024):
    """x: (B, s_dim); fused params from prepare_policy_laplace_params.

    Returns (loc, scale), each (B, a_dim) — the Laplace distribution params.
    """
    B, s_dim = x.shape
    width = w_fused.shape[1]
    assert width >= 2 * a_dim

    x_bytes = jnp.dtype(x.dtype).itemsize
    w_bytes = jnp.dtype(w_fused.dtype).itemsize
    b_bytes = jnp.dtype(b_fused.dtype).itemsize

    # ---- generation-aware VMEM budget & tile_b selection -------------------
    cap = _vmem_capacity_bytes()
    budget = (cap * 3) // 4  # headroom for Mosaic internal scratch
    # Grid-invariant weights/bias: double-buffered by the default pipeline but
    # never re-fetched (constant block index); count them once, not twice.
    resident = 2 * (w_fused.size * w_bytes + b_fused.size * b_bytes)
    per_row = 2 * (s_dim * x_bytes + width * x_bytes)  # dbl-buffered x + out slab
    max_rows = max(8, (budget - resident) // per_row)
    tile_cap = max(8, (min(tb, max_rows) // 8) * 8)

    # Minimal-padding tiling: fewest tiles of size <= tile_cap; force >= 2
    # tiles when B is big enough so ("parallel",) shards across v7x's 2 TCs.
    num_tiles = pl.cdiv(B, tile_cap)
    if B >= 16:
        num_tiles = max(num_tiles, 2)
    tile_b = _round_up(pl.cdiv(B, num_tiles), 8)
    b_pad = num_tiles * tile_b
    if b_pad != B:
        # Pads at most tile_b - 1 rows.
        # TODO(synk): handle the ragged last tile in-kernel to avoid this
        # extra HBM pass over x when B is not a multiple of 8/tile_b.
        x = jnp.pad(x, ((0, b_pad - B), (0, 0)))
    grid = (num_tiles,)

    vmem_limit = int(min(max(per_row * tile_b + resident + (4 << 20), 16 << 20), cap))

    cost = pl.CostEstimate(
        flops=2 * b_pad * s_dim * width,
        transcendentals=b_pad * width,
        bytes_accessed=(b_pad * s_dim * x_bytes + w_fused.size * w_bytes
                        + b_fused.size * b_bytes + b_pad * width * x_bytes),
    )

    out = pl.pallas_call(
        functools.partial(policy_laplace_kernel, a_dim=a_dim),
        out_shape=jax.ShapeDtypeStruct((b_pad, width), x.dtype),
        grid=grid,
        in_specs=[
            pl.BlockSpec((tile_b, s_dim), lambda i: (i, 0)),   # batch-tiled x
            pl.BlockSpec((s_dim, width), lambda i: (0, 0)),    # fused weights (VMEM-resident)
            pl.BlockSpec((1, width), lambda i: (0, 0)),        # fused bias    (VMEM-resident)
        ],
        out_specs=pl.BlockSpec((tile_b, width), lambda i: (i, 0)),
        compiler_params=pltpu.CompilerParams(
            dimension_semantics=("parallel",),
            vmem_limit_bytes=vmem_limit,
        ),
        cost_estimate=cost,
    )(x, w_fused, b_fused)

    # Strip batch padding and split the packed slab into (loc, scale).
    return out[:B, :a_dim], out[:B, a_dim:2 * a_dim]


def _init_params(key, s_dim, a_dim, dtype=jnp.float32):
    # Deterministic init mimicking nn.Linear's U(-1/sqrt(s_dim), 1/sqrt(s_dim)).
    k1, k2, k3, k4 = jax.random.split(key, 4)
    bound = 1.0 / (s_dim ** 0.5)
    w_loc = jax.random.uniform(k1, (a_dim, s_dim), dtype, -bound, bound)
    b_loc = jax.random.uniform(k2, (a_dim,), dtype, -bound, bound)
    w_scale = jax.random.uniform(k3, (a_dim, s_dim), dtype, -bound, bound)
    b_scale = jax.random.uniform(k4, (a_dim,), dtype, -bound, bound)
    return w_loc, b_loc, w_scale, b_scale


if __name__ == "__main__":
    key = jax.random.PRNGKey(0)
    k_x, k_x2, k_p = jax.random.split(key, 3)

    B, s_dim, a_dim = 2, 32, 8   # small shapes: batch=2, state dim=32, action dim=8
    x = jax.random.normal(k_x, (B, s_dim), jnp.float32)
    w_loc, b_loc, w_scale, b_scale = _init_params(k_p, s_dim, a_dim)

    # --- f32 compute path (exact torch semantics) ---------------------------
    w_fused, b_fused = prepare_policy_laplace_params(w_loc, b_loc, w_scale, b_scale)
    loc, scale = policy_laplace_forward(x, w_fused, b_fused, a_dim=a_dim)
    jax.block_until_ready((loc, scale))

    loc_ref = x @ w_loc.T + b_loc
    scale_ref = jnp.exp(x @ w_scale.T + b_scale)
    assert loc.shape == (B, a_dim) and scale.shape == (B, a_dim)
    assert jnp.allclose(loc, loc_ref, atol=1e-5, rtol=1e-5)
    assert jnp.allclose(scale, scale_ref, atol=1e-5, rtol=1e-5)
    assert bool(jnp.all(scale > 0))   # valid Laplace scale parameter

    # --- multi-tile grid + ragged batch (B=40, tb=16 -> 3 tiles, 8 pad rows) -
    B2 = 40
    x2 = jax.random.normal(k_x2, (B2, s_dim), jnp.float32)
    loc2, scale2 = policy_laplace_forward(x2, w_fused, b_fused, a_dim=a_dim, tb=16)
    jax.block_until_ready((loc2, scale2))
    assert jnp.allclose(loc2, x2 @ w_loc.T + b_loc, atol=1e-5, rtol=1e-5)
    assert jnp.allclose(scale2, jnp.exp(x2 @ w_scale.T + b_scale), atol=1e-5, rtol=1e-5)

    # --- bf16-weights compute path (native MXU rate, f32 accumulation) ------
    w_bf16, b_f32 = prepare_policy_laplace_params(w_loc, b_loc, w_scale, b_scale,
                                                  compute_dtype=jnp.bfloat16)
    loc3, scale3 = policy_laplace_forward(x2, w_bf16, b_f32, a_dim=a_dim)
    jax.block_until_ready((loc3, scale3))
    assert jnp.allclose(loc3, x2 @ w_loc.T + b_loc, atol=5e-2, rtol=5e-2)
    assert jnp.allclose(scale3, jnp.exp(x2 @ w_scale.T + b_scale), atol=5e-2, rtol=5e-2)
    assert bool(jnp.all(scale3 > 0))

    print("KERNEL_OK")
</pallas_src>

<mosaic_0001>
module attributes {stable_mosaic.version = 11 : i64} {
  func.func @policy_laplace_kernel(%arg0: i32, %arg1: memref<8x32xf32, #tpu.memory_space<vmem>>, %arg2: memref<32x128xf32, #tpu.memory_space<vmem>>, %arg3: memref<1x128xf32, #tpu.memory_space<vmem>>, %arg4: memref<8x128xf32, #tpu.memory_space<vmem>>) attributes {dimension_semantics = [#tpu.dimension_semantics<parallel>], iteration_bounds = array<i64: 1>, scalar_prefetch = 0 : i64, scratch_operands = 0 : i64, tpu.core_type = #tpu.core_type<tc>, window_params = [{transform_indices = @transform_0, window_bounds = array<i64: 8, 32>}, {pipeline_mode = #tpu.pipeline_mode<synchronous>, transform_indices = @transform_1, window_bounds = array<i64: 32, 128>}, {pipeline_mode = #tpu.pipeline_mode<synchronous>, transform_indices = @transform_2, window_bounds = array<i64: 1, 128>}, {transform_indices = @transform_3, window_bounds = array<i64: 8, 128>}]} {
    %c0 = arith.constant 0 : index
    %c0_0 = arith.constant 0 : index
    %0 = vector.load %arg1[%c0, %c0_0] : memref<8x32xf32, #tpu.memory_space<vmem>>, vector<8x32xf32>
    %c0_1 = arith.constant 0 : index
    %c0_2 = arith.constant 0 : index
    %1 = vector.load %arg2[%c0_1, %c0_2] : memref<32x128xf32, #tpu.memory_space<vmem>>, vector<32x128xf32>
    %cst = arith.constant dense<0.000000e+00> : vector<8x128xf32>
    %2 = tpu.matmul %0, %1, %cst {dimension_numbers = #tpu.dot_dimension_numbers<[1], [0], [0], [1], [0, 0, 1, 1], [], []>} : vector<8x32xf32>, vector<32x128xf32>, vector<8x128xf32> -> vector<8x128xf32>
    %c0_3 = arith.constant 0 : index
    %c0_4 = arith.constant 0 : index
    %3 = vector.load %arg3[%c0_3, %c0_4] : memref<1x128xf32, #tpu.memory_space<vmem>>, vector<1x128xf32>
    %4 = vector.broadcast %3 : vector<1x128xf32> to vector<8x128xf32>
    %5 = arith.addf %2, %4 : vector<8x128xf32>
    %6 = tpu.iota {dimensions = array<i32: 1>} : vector<8x128xi32>
    %c8_i32 = arith.constant 8 : i32
    %7 = vector.broadcast %c8_i32 : i32 to vector<8x128xi32>
    %8 = arith.cmpi sge, %6, %7 : vector<8x128xi32>
    %c16_i32 = arith.constant 16 : i32
    %9 = vector.broadcast %c16_i32 : i32 to vector<8x128xi32>
    %10 = arith.cmpi slt, %6, %9 : vector<8x128xi32>
    %11 = arith.andi %8, %10 : vector<8x128xi1>
    %12 = math.exp %5 : vector<8x128xf32>
    %13 = arith.select %11, %12, %5 : vector<8x128xi1>, vector<8x128xf32>
    %c0_5 = arith.constant 0 : index
    %c0_6 = arith.constant 0 : index
    %14 = vector.load %arg4[%c0_5, %c0_6] : memref<8x128xf32, #tpu.memory_space<vmem>>, vector<8x128xf32>
    tpu.vector_store %arg4[%c0_5, %c0_6], %13 {strides = array<i32>} : memref<8x128xf32, #tpu.memory_space<vmem>>, vector<8x128xf32>,
    return
  }
  func.func @transform_0(%arg0: i32) -> (i32, i32) {
    %c0_i32 = arith.constant 0 : i32
    %c0_i32_0 = arith.constant 0 : i32
    return %arg0, %c0_i32 : i32, i32
  }
  func.func @transform_1(%arg0: i32) -> (i32, i32) {
    %c0_i32 = arith.constant 0 : i32
    %c0_i32_0 = arith.constant 0 : i32
    %c0_i32_1 = arith.constant 0 : i32
    return %c0_i32, %c0_i32_0 : i32, i32
  }
  func.func @transform_2(%arg0: i32) -> (i32, i32) {
    %c0_i32 = arith.constant 0 : i32
    %c0_i32_0 = arith.constant 0 : i32
    %c0_i32_1 = arith.constant 0 : i32
    return %c0_i32, %c0_i32_0 : i32, i32
  }
  func.func @transform_3(%arg0: i32) -> (i32, i32) {
    %c0_i32 = arith.constant 0 : i32
    %c0_i32_0 = arith.constant 0 : i32
    return %arg0, %c0_i32 : i32, i32
  }
}

</mosaic_0001>

<bundles_post_ra>
// kernel: policy_laplace_forward.1
= control target key start
LH: loop header
LB: loop body
LE: loop exit
PB: predicated region body
PF: predicated region fallthrough
CT: control target
= control target key end

     0   :  { %8 = vsyncpa [#allocation3], 0  ;;  %s184_s12 = smov [#allocation2]   ;;  %s231_s0 = inlined_call_operand.vmem [shape: f32[8,32], index: 0, kind: input, shape index: {}]   ;;  %s232_s1 = inlined_call_operand.hbm [shape: f32[32,128], index: 1, kind: input, shape index: {}]   ;;  %s233_s2 = inlined_call_operand.vmem [shape: f32[1,128], index: 2, kind: input, shape index: {}]   ;;  %s234_s3 = inlined_call_operand.vmem [shape: f32[8,128], index: 3, kind: output, shape index: {}]  }
   0x1   :  { %s16_s13 = sshll.u32 %s184_s12, 4  ;;  %s160_s16 = scalar_lea.hbm %s232_s1, 512  ;;  %s17_s13 = int_to_ptr.vmem [resolvable:$true] %s16_s13 }
   0x2   :  { %p161_p0 = scmp.ne.s32.totalorder %s232_s1, %s160_s16  ;;  %p164_p1 = scmp.lt.u32.totalorder %s160_s16, %s232_s1 }
   0x4   :  { %p166_p2 = pnand %p164_p1, %p161_p0 }
   0x6   :  { %169 = shalt.err (!%p166_p2)
}
   0x7   :  { %s170_s21 = scalar_lea.vmem %s17_s13, 512  ;;  %p175_p4 = scmp.lt.s32.totalorder %s17_s13, %s17_s13 }
   0x8   :  { %p171_p3 = scmp.ne.s32.totalorder %s17_s13, %s170_s21  ;;  %p176_p5 = scmp.lt.s32.totalorder %s170_s21, %s170_s21 }
   0xa   :  { %p177_p6 = por %p176_p5, %p175_p4 }
   0xc   :  { %p178_p7 = pnand %p177_p6, %p171_p3 }
   0xe   :  { %181 = shalt.err (!%p178_p7)
}
   0xf   :  { %s185_s22 = smov 128   ;;  %s186_s23 = smov 8  }
  0x10   :  { %22 = dma.hbm_to_vmem [thread:$0]  %s232_s1, 512, %s17_s13, [#allocation3], %s185_s22, %s185_s22, %s186_s23  }
  0x11   :  { %182 = dma.done.wait [#allocation3], 512  }
  0x12   :  { %183 = vsyncadd [#allocation3], 4294966784  ;;  %v187_v0 = vmov 0.0|0.0   ;;  %vm188_vm0 = vmmov 0   ;;  %v189_v1 = vmov 0.0   ;;  %v29_v2 = vld [vmem:[#allocation2] sm:$0xff]  ;;  %v114_v13 = vlaneseq }
  0x13   :  { %146 = vmatprep.subr.bf16.mxu0 %v187_v0  ;;  %143 = vmatprep.mubr.msk.f32.mxu0 %vm188_vm0, %v189_v1  ;;  %v30_v3 = vld [vmem:[#allocation2 + $0x8] sm:$0xff]  ;;  %v31_v4 = vld [vmem:[#allocation2 + $0x10] sm:$0xff]  ;;  %v32_v6 = vld [vmem:[#allocation2 + $0x18] sm:$0xff]  ;;  %vm40_vm1 = vcmask 261120  }
  0x14   :  { %v147_v5 = vpack.c.bf16 %v30_v3, %v29_v2  ;;  %v150_v7 = vpack.c.bf16 %v32_v6, %v31_v4  ;;  %v28_v8 = vld [vmem:[%s231_s0] sm:$0xff]  ;;  %v115_v15 = vand.u32 127, %v114_v13 }
  0x15   :  { %v128_v9 = vld [vmem:[%s233_s2] ss:$0 sm:$0xff] }
  0x16   :  { %148 = vmatpush3.bf16.msra.mxu0 %v147_v5  ;;  %vm116_vm2 = vcmp.ge.s32.totalorder %v115_v15, 8  ;;  %vm117_vm3 = vcmp.lt.s32.totalorder %v115_v15, 16 }
  0x17   :  { %149 = vmatprep.subr.bf16.mxu0 %v187_v0  ;;  %vm118_vm4 = vmand %vm116_vm2, %vm117_vm3 }
  0x1a   :  { %151 = vmatpush3.bf16.msra.mxu0 %v150_v7 }
  0x1d   :  { %144 = vmatmul.mubr.msk.f32.vlgmr.msra.gmra.mrb[0].mxu0 %vm40_vm1, %v28_v8 }
  0xf0   :  { %v110_v10 = vpop.f32.mrb[0].mxu0 }
  0xf1   :  { %v111_v11 = vadd.f32 %v128_v9, %v110_v10  ;;  %v145_v12 = vpop.f32.mrb[1].mxu0 }
  0xf3   :  { %v119_v14 = vmul.f32 1.442695, %v111_v11 }
  0xf5   :  { %158 = vpow2.f32 %v119_v14 }
  0xff   :  { %v159_v16 = vpop.eup %158 }
 0x100   :  { %v121_v17 = vsel %vm118_vm4, %v159_v16, %v111_v11 }
 0x101   :  { %122 = vst [vmem:[%s234_s3] sm:$0xff] %v121_v17 }
 0x102   :  { %127 = vsyncpa [#allocation3], 1 }

</bundles_post_ra>
